<compile_context>
chip_gen: v6e
topology: v6e:2x2x1
jax: 0.10.0
libtpu: 0.0.40
codegen_flags: <defaults>
</compile_context>

<pallas_src>
import math

import jax
import jax.numpy as jnp
from jax import lax
from jax.experimental import pallas as pl
from jax.experimental.pallas import tpu as pltpu


def _round_up(x: int, m: int) -> int:
    return ((x + m - 1) // m) * m


def _tile_and_pad(dim: int, pref: int, align: int, min_blocks: int = 1):
    """Choose a tile ~`pref` (aligned) and pad `dim` up to a multiple of it.

    Instead of shrinking the tile until it divides the dim (which can collapse
    to 8- or 128-wide tiles for awkward factors), choose the block count and
    round the dim up; padding is zero-filled and sliced off by the caller.
    """
    dim_al = _round_up(max(dim, align), align)
    n_blocks = max(min_blocks, -(-dim_al // max(pref, align)))  # ceil-div
    tile = _round_up(-(-dim_al // n_blocks), align)
    return tile, n_blocks * tile


def _make_linear_kernel(has_bias: bool, use_scratch: bool):
    """Kernel factory: args are (x, w, [b], o, [acc])."""

    def kernel(*refs):
        if has_bias:
            x_ref, w_ref, b_ref, o_ref = refs[:4]
            scratch = refs[4:]
        else:
            x_ref, w_ref, o_ref = refs[:3]
            b_ref = None
            scratch = refs[3:]
        acc_ref = scratch[0] if use_scratch else o_ref

        k = pl.program_id(2)

        # x: (tm, tk), w: (tn, tk) in torch (out, in) layout; contract the
        # last dim of both -> (tm, tn).  Output stays lane-dense in N and no
        # wrapper-side transpose / extra HBM pass is needed.
        contrib = lax.dot_general(
            x_ref[...],
            w_ref[...],
            dimension_numbers=(((1,), (1,)), ((), ())),
            preferred_element_type=jnp.float32,
        )

        @pl.when(k == 0)
        def _():
            first = contrib
            if b_ref is not None:
                first = first + b_ref[...].astype(jnp.float32)
            acc_ref[...] = first.astype(acc_ref.dtype)

        @pl.when(k > 0)
        def _():
            acc_ref[...] += contrib.astype(acc_ref.dtype)

        if use_scratch:
            @pl.when(k == pl.num_programs(2) - 1)
            def _():
                o_ref[...] = acc_ref[...].astype(o_ref.dtype)

    return kernel


def linear_final(x, weight, bias=None, *, tm_pref=512, tn_pref=512, tk_pref=1024):
    """F.linear semantics: y = x @ weight.T + bias.

    x:      (..., in_features)
    weight: (out_features, in_features)   (torch nn.Linear layout, kept as-is)
    bias:   (out_features,) or None
    returns (..., out_features)
    """
    out_features, in_features = weight.shape
    assert x.shape[-1] == in_features

    lead_shape = x.shape[:-1]
    M = math.prod(lead_shape) if lead_shape else 1
    x2d = x.reshape(M, in_features)

    out_dtype = x.dtype
    x_item = jnp.dtype(x.dtype).itemsize
    w_item = jnp.dtype(weight.dtype).itemsize
    o_item = jnp.dtype(out_dtype).itemsize

    # Sublane packing minimum depends on dtype width (8 f32, 16 bf16, 32 int8).
    sub_align = {4: 8, 2: 16, 1: 32}.get(x_item, 8)

    tm, M_pad = _tile_and_pad(M, tm_pref, sub_align)
    tk, K_pad = _tile_and_pad(in_features, tk_pref, 128)
    tn, N_pad = _tile_and_pad(out_features, tn_pref, 128)

    # v7x has 2 TensorCores per chip: if the parallel (M, N) grid degenerates
    # to a single block and N is big enough, split along N (cheaper than M).
    if (M_pad // tm) * (N_pad // tn) == 1 and N_pad >= 256:
        tn, N_pad = _tile_and_pad(out_features, tn_pref, 128, min_blocks=2)

    # Zero-pad operands to aligned, tile-divisible shapes (skipped entirely
    # for the common already-aligned case, so no extra HBM pass).
    if (M, in_features) != (M_pad, K_pad):
        x2d = jnp.pad(x2d, ((0, M_pad - M), (0, K_pad - in_features)))
    w2d = weight
    if (out_features, in_features) != (N_pad, K_pad):
        w2d = jnp.pad(weight, ((0, N_pad - out_features), (0, K_pad - in_features)))

    grid = (M_pad // tm, N_pad // tn, K_pad // tk)
    k_blocks = grid[2]

    # Skip the VMEM scratch accumulator when we can accumulate directly in the
    # resident output block (f32 output) or when there is only one K step.
    use_scratch = not (out_dtype == jnp.float32 or k_blocks == 1)

    x_spec = pl.BlockSpec((tm, tk), lambda i, j, k: (i, k))
    w_spec = pl.BlockSpec((tn, tk), lambda i, j, k: (j, k))  # torch (N, K) layout
    o_spec = pl.BlockSpec((tm, tn), lambda i, j, k: (i, j))

    in_specs = [x_spec, w_spec]
    operands = [x2d, w2d]

    b_item = 0
    if bias is not None:
        b_item = jnp.dtype(bias.dtype).itemsize
        b2d = bias.reshape(1, out_features)
        if N_pad != out_features:
            b2d = jnp.pad(b2d, ((0, 0), (0, N_pad - out_features)))
        in_specs.append(pl.BlockSpec((1, tn), lambda i, j, k: (0, j)))
        operands.append(b2d)

    scratch_shapes = [pltpu.VMEM((tm, tn), jnp.float32)] if use_scratch else []

    # VMEM budget: double-buffered x/w/out tiles (+ accumulator + bias), with
    # headroom, clamped to [32 MiB, 48 MiB] so it raises v5e's 16 MiB scoped
    # default and stays well inside v7x's 64 MiB physical VMEM.
    footprint = (
        2 * tm * tk * x_item
        + 2 * tn * tk * w_item
        + 2 * tm * tn * o_item
        + (tm * tn * 4 if use_scratch else 0)
        + (2 * tn * b_item if bias is not None else 0)
    )
    vmem_limit = int(min(max(footprint * 3 // 2 + (2 << 20), 32 << 20), 48 << 20))

    # Truthful traffic estimate (includes operand re-reads across N/M blocks).
    cost = pl.CostEstimate(
        flops=2 * M_pad * N_pad * K_pad,
        transcendentals=0,
        bytes_accessed=(
            M_pad * K_pad * x_item * (N_pad // tn)
            + K_pad * N_pad * w_item * (M_pad // tm)
            + M_pad * N_pad * o_item
            + (N_pad * b_item if bias is not None else 0)
        ),
    )

    kernel = _make_linear_kernel(bias is not None, use_scratch)

    out_pad = pl.pallas_call(
        kernel,
        out_shape=jax.ShapeDtypeStruct((M_pad, N_pad), out_dtype),
        grid_spec=pltpu.PrefetchScalarGridSpec(
            num_scalar_prefetch=0,
            grid=grid,
            in_specs=in_specs,
            out_specs=o_spec,
            scratch_shapes=scratch_shapes,
        ),
        compiler_params=pltpu.CompilerParams(
            dimension_semantics=("parallel", "parallel", "arbitrary"),
            vmem_limit_bytes=vmem_limit,
        ),
        cost_estimate=cost,
    )(*operands)

    out2d = out_pad[:M, :out_features]
    return out2d.reshape(*lead_shape, out_features)


if __name__ == "__main__":
    key = jax.random.PRNGKey(0)
    k_x, k_w, k_b, k_x2, k_w2, k_b2 = jax.random.split(key, 6)

    # ---- Test 1: f32, with bias (single K block, direct-to-output path) ----
    batch, seq = 2, 8
    in_features, out_features = 32, 16
    bound = 1.0 / (in_features ** 0.5)
    weight = jax.random.uniform(
        k_w, (out_features, in_features), jnp.float32, -bound, bound)
    bias = jax.random.uniform(k_b, (out_features,), jnp.float32, -bound, bound)
    x = jax.random.normal(k_x, (batch, seq, in_features), jnp.float32)

    y = jax.block_until_ready(linear_final(x, weight, bias))
    y_ref = x @ weight.T + bias
    assert y.shape == (batch, seq, out_features)
    assert jnp.allclose(y, y_ref, atol=1e-4, rtol=1e-4)

    # ---- Test 2: f32, no bias ----
    y_nb = jax.block_until_ready(linear_final(x, weight, None))
    assert jnp.allclose(y_nb, x @ weight.T, atol=1e-4, rtol=1e-4)

    # ---- Test 3: bf16, multiple K blocks (VMEM-scratch accumulator path) ----
    in2, out2, m2 = 256, 192, 4
    bound2 = 1.0 / (in2 ** 0.5)
    w2 = jax.random.uniform(k_w2, (out2, in2), jnp.float32, -bound2, bound2
                            ).astype(jnp.bfloat16)
    b2 = jax.random.uniform(k_b2, (out2,), jnp.float32, -bound2, bound2
                            ).astype(jnp.bfloat16)
    x2 = jax.random.normal(k_x2, (m2, in2), jnp.bfloat16)

    y2 = jax.block_until_ready(linear_final(x2, w2, b2, tk_pref=128))
    y2_ref = (x2.astype(jnp.float32) @ w2.astype(jnp.float32).T
              + b2.astype(jnp.float32))
    assert y2.shape == (m2, out2)
    assert jnp.allclose(y2.astype(jnp.float32), y2_ref, atol=2e-2, rtol=2e-2)

    print("KERNEL_OK")
</pallas_src>

<mosaic_0001>
module attributes {stable_mosaic.version = 11 : i64} {
  func.func @kernel(%arg0: i32, %arg1: i32, %arg2: i32, %arg3: memref<16x128xf32, #tpu.memory_space<vmem>>, %arg4: memref<128x128xf32, #tpu.memory_space<vmem>>, %arg5: memref<1x128xf32, #tpu.memory_space<vmem>>, %arg6: memref<16x128xf32, #tpu.memory_space<vmem>>) attributes {dimension_semantics = [#tpu.dimension_semantics<parallel>, #tpu.dimension_semantics<parallel>, #tpu.dimension_semantics<arbitrary>], iteration_bounds = array<i64: 1, 1, 1>, scalar_prefetch = 0 : i64, scratch_operands = 0 : i64, tpu.core_type = #tpu.core_type<tc>, window_params = [{transform_indices = @transform_0, window_bounds = array<i64: 16, 128>}, {transform_indices = @transform_1, window_bounds = array<i64: 128, 128>}, {transform_indices = @transform_2, window_bounds = array<i64: 1, 128>}, {transform_indices = @transform_3, window_bounds = array<i64: 16, 128>}]} {
    %c0 = arith.constant 0 : index
    %c0_0 = arith.constant 0 : index
    %0 = vector.load %arg3[%c0, %c0_0] : memref<16x128xf32, #tpu.memory_space<vmem>>, vector<16x128xf32>
    %c0_1 = arith.constant 0 : index
    %c0_2 = arith.constant 0 : index
    %1 = vector.load %arg4[%c0_1, %c0_2] : memref<128x128xf32, #tpu.memory_space<vmem>>, vector<128x128xf32>
    %cst = arith.constant dense<0.000000e+00> : vector<16x128xf32>
    %2 = tpu.matmul %0, %1, %cst {dimension_numbers = #tpu.dot_dimension_numbers<[1], [1], [0], [0], [0, 0, 1, 0], [], []>} : vector<16x128xf32>, vector<128x128xf32>, vector<16x128xf32> -> vector<16x128xf32>
    %c0_i32 = arith.constant 0 : i32
    %3 = arith.cmpi eq, %arg2, %c0_i32 : i32
    %4 = arith.extui %3 : i1 to i32
    %c0_i32_3 = arith.constant 0 : i32
    %5 = arith.cmpi ne, %4, %c0_i32_3 : i32
    scf.if %5 {
      %c0_6 = arith.constant 0 : index
      %c0_7 = arith.constant 0 : index
      %9 = vector.load %arg5[%c0_6, %c0_7] : memref<1x128xf32, #tpu.memory_space<vmem>>, vector<1x128xf32>
      %10 = vector.broadcast %9 : vector<1x128xf32> to vector<16x128xf32>
      %11 = arith.addf %2, %10 : vector<16x128xf32>
      %c0_8 = arith.constant 0 : index
      %c0_9 = arith.constant 0 : index
      %12 = vector.load %arg6[%c0_8, %c0_9] : memref<16x128xf32, #tpu.memory_space<vmem>>, vector<16x128xf32>
      tpu.vector_store %arg6[%c0_8, %c0_9], %11 {strides = array<i32>} : memref<16x128xf32, #tpu.memory_space<vmem>>, vector<16x128xf32>,
    } else {
    }
    %c0_i32_4 = arith.constant 0 : i32
    %6 = arith.cmpi sgt, %arg2, %c0_i32_4 : i32
    %7 = arith.extui %6 : i1 to i32
    %c0_i32_5 = arith.constant 0 : i32
    %8 = arith.cmpi ne, %7, %c0_i32_5 : i32
    scf.if %8 {
      %c0_6 = arith.constant 0 : index
      %c0_7 = arith.constant 0 : index
      %9 = vector.load %arg6[%c0_6, %c0_7] : memref<16x128xf32, #tpu.memory_space<vmem>>, vector<16x128xf32>
      %10 = arith.addf %9, %2 : vector<16x128xf32>
      %c0_8 = arith.constant 0 : index
      %c0_9 = arith.constant 0 : index
      %11 = vector.load %arg6[%c0_8, %c0_9] : memref<16x128xf32, #tpu.memory_space<vmem>>, vector<16x128xf32>
      tpu.vector_store %arg6[%c0_8, %c0_9], %10 {strides = array<i32>} : memref<16x128xf32, #tpu.memory_space<vmem>>, vector<16x128xf32>,
    } else {
    }
    return
  }
  func.func @transform_0(%arg0: i32, %arg1: i32, %arg2: i32) -> (i32, i32) {
    %c0_i32 = arith.constant 0 : i32
    return %arg0, %arg2 : i32, i32
  }
  func.func @transform_1(%arg0: i32, %arg1: i32, %arg2: i32) -> (i32, i32) {
    %c0_i32 = arith.constant 0 : i32
    return %arg1, %arg2 : i32, i32
  }
  func.func @transform_2(%arg0: i32, %arg1: i32, %arg2: i32) -> (i32, i32) {
    %c0_i32 = arith.constant 0 : i32
    %c0_i32_0 = arith.constant 0 : i32
    return %c0_i32, %arg1 : i32, i32
  }
  func.func @transform_3(%arg0: i32, %arg1: i32, %arg2: i32) -> (i32, i32) {
    %c0_i32 = arith.constant 0 : i32
    return %arg0, %arg1 : i32, i32
  }
}

</mosaic_0001>

<bundles_post_ra>
// kernel: tpu_custom_call.1
= control target key start
LH: loop header
LB: loop body
LE: loop exit
PB: predicated region body
PF: predicated region fallthrough
CT: control target
= control target key end

     0   :  { %8 = vsyncpa [#allocation3], 0  ;;  %s350_s0 = inlined_call_operand.hbm [shape: f32[16,128], index: 0, kind: input, shape index: {}]   ;;  %s351_s1 = inlined_call_operand.hbm [shape: f32[128,128], index: 1, kind: input, shape index: {}]   ;;  %s352_s2 = inlined_call_operand.vmem [shape: f32[1,128], index: 2, kind: input, shape index: {}]   ;;  %s353_s3 = inlined_call_operand.hbm [shape: f32[16,128], index: 3, kind: output, shape index: {}]  }
   0x1   :  { %9 = vsyncpa [#allocation6], 0 }
   0x2   :  { %10 = vsyncpa [#allocation4], 0  ;;  %s304_s12 = smov [#allocation2]  }
   0x3   :  { %s16_s13 = sshll.u32 %s304_s12, 4  ;;  %s17_s13 = int_to_ptr.vmem [resolvable:$true] %s16_s13 }
   0x4   :  { %s246_s14 = scalar_lea.vmem %s17_s13, 256  ;;  %p251_p1 = scmp.lt.s32.totalorder %s17_s13, %s17_s13 }
   0x5   :  { %p247_p0 = scmp.ne.s32.totalorder %s17_s13, %s246_s14  ;;  %p252_p2 = scmp.lt.s32.totalorder %s246_s14, %s246_s14 }
   0x7   :  { %p253_p3 = por %p252_p2, %p251_p1 }
   0x9   :  { %p254_p4 = pnand %p253_p3, %p247_p0 }
   0xb   :  { %257 = shalt.err (!%p254_p4)
}
   0xc   :  { %s305_s15 = smov 128   ;;  %s306_s16 = smov 8  }
   0xd   :  { %22 = dma.hbm_to_vmem [thread:$0]  %s350_s0, 256, %s17_s13, [#allocation3], %s305_s15, %s305_s15, %s306_s16  }
   0xe   :  { %s307_s19 = smov [#allocation5]  }
   0xf   :  { %s28_s20 = sshll.u32 %s307_s19, 4  ;;  %s29_s20 = int_to_ptr.vmem [resolvable:$true] %s28_s20 }
  0x10   :  { %s266_s21 = scalar_lea.vmem %s29_s20, 2048  ;;  %p271_p6 = scmp.lt.s32.totalorder %s29_s20, %s29_s20 }
  0x11   :  { %p267_p5 = scmp.ne.s32.totalorder %s29_s20, %s266_s21  ;;  %p272_p7 = scmp.lt.s32.totalorder %s266_s21, %s266_s21 }
  0x13   :  { %p273_p8 = por %p272_p7, %p271_p6 }
  0x15   :  { %p274_p9 = pnand %p273_p8, %p267_p5 }
  0x17   :  { %277 = shalt.err (!%p274_p9)
}
  0x18   :  { %34 = dma.hbm_to_vmem [thread:$0]  %s351_s1, 2048, %s29_s20, [#allocation6], %s305_s15, %s305_s15, %s306_s16  }
  0x19   :  { %298 = dma.done.wait [#allocation3], 256  }
  0x1a   :  { %299 = vsyncadd [#allocation3], 4294967040 }
  0x1b   :  { %300 = dma.done.wait [#allocation6], 2048  }
  0x1c   :  { %301 = vsyncadd [#allocation6], 4294965248  ;;  %v60_v0 = vld [vmem:[#allocation5 + $0x78] sm:$0xff]  ;;  %v59_v1 = vld [vmem:[#allocation5 + $0x70] sm:$0xff]  ;;  %s308_s24 = smov [#allocation7]  }
  0x1d   :  { %198 = vmatprep.subr.mxu0 %v60_v0  ;;  %v58_v2 = vld [vmem:[#allocation5 + $0x68] sm:$0xff]  ;;  %v43_v3 = vld [vmem:[#allocation2] sm:$0xff]  ;;  %v57_v4 = vld [vmem:[#allocation5 + $0x60] sm:$0xff]  ;;  %s166_s25 = sshll.u32 %s308_s24, 4  ;;  %s167_s25 = int_to_ptr.vmem [resolvable:$true] %s166_s25 }
  0x1e   :  { %199 = vmatpush3.xpose.msra.mxu0 %v60_v0  ;;  %230 = vmatprep.mubr.f32.mxu0 %v43_v3  ;;  %v56_v5 = vld [vmem:[#allocation5 + $0x58] sm:$0xff]  ;;  %v55_v6 = vld [vmem:[#allocation5 + $0x50] sm:$0xff]  ;;  %v54_v7 = vld [vmem:[#allocation5 + $0x48] sm:$0xff]  ;;  %s278_s26 = scalar_lea.vmem %s167_s25, 256  ;;  %p283_p11 = scmp.lt.s32.totalorder %s167_s25, %s167_s25 }
  0x1f   :  { %200 = vmatprep.subr.mxu0 %v59_v1  ;;  %v53_v8 = vld [vmem:[#allocation5 + $0x40] sm:$0xff]  ;;  %v52_v9 = vld [vmem:[#allocation5 + $0x38] sm:$0xff]  ;;  %v51_v10 = vld [vmem:[#allocation5 + $0x30] sm:$0xff]  ;;  %p279_p10 = scmp.ne.s32.totalorder %s167_s25, %s278_s26  ;;  %p284_p12 = scmp.lt.s32.totalorder %s278_s26, %s278_s26 }
  0x20   :  { %v50_v11 = vld [vmem:[#allocation5 + $0x28] sm:$0xff]  ;;  %v49_v12 = vld [vmem:[#allocation5 + $0x20] sm:$0xff]  ;;  %v48_v13 = vld [vmem:[#allocation5 + $0x18] sm:$0xff] }
  0x21   :  { %v47_v14 = vld [vmem:[#allocation5 + $0x10] sm:$0xff]  ;;  %v46_v15 = vld [vmem:[#allocation5 + $0x8] sm:$0xff]  ;;  %v45_v16 = vld [vmem:[#allocation5] sm:$0xff]  ;;  %p285_p13 = por %p284_p12, %p283_p11 }
  0x22   :  { %201 = vmatpush3.xpose.msra.mxu0 %v59_v1  ;;  %v44_v17 = vld [vmem:[#allocation2 + $0x8] sm:$0xff]  ;;  %v179_v18 = vld [vmem:[%s352_s2] ss:$0 sm:$0xff] }
  0x23   :  { %202 = vmatprep.subr.mxu0 %v58_v2  ;;  %p286_p0 = pnand %p285_p13, %p279_p10 }
  0x26   :  { %203 = vmatpush3.xpose.msra.mxu0 %v58_v2 }
  0x27   :  { %204 = vmatprep.subr.mxu0 %v57_v4 }
  0x2a   :  { %205 = vmatpush3.xpose.msra.mxu0 %v57_v4 }
  0x2b   :  { %206 = vmatprep.subr.mxu0 %v56_v5 }
  0x2e   :  { %207 = vmatpush3.xpose.msra.mxu0 %v56_v5 }
  0x2f   :  { %208 = vmatprep.subr.mxu0 %v55_v6 }
  0x32   :  { %209 = vmatpush3.xpose.msra.mxu0 %v55_v6 }
  0x33   :  { %210 = vmatprep.subr.mxu0 %v54_v7 }
  0x36   :  { %211 = vmatpush3.xpose.msra.mxu0 %v54_v7 }
  0x37   :  { %212 = vmatprep.subr.mxu0 %v53_v8 }
  0x3a   :  { %213 = vmatpush3.xpose.msra.mxu0 %v53_v8 }
  0x3b   :  { %214 = vmatprep.subr.mxu0 %v52_v9 }
  0x3e   :  { %215 = vmatpush3.xpose.msra.mxu0 %v52_v9 }
  0x3f   :  { %216 = vmatprep.subr.mxu0 %v51_v10 }
  0x42   :  { %217 = vmatpush3.xpose.msra.mxu0 %v51_v10 }
  0x43   :  { %218 = vmatprep.subr.mxu0 %v50_v11 }
  0x46   :  { %219 = vmatpush3.xpose.msra.mxu0 %v50_v11 }
  0x47   :  { %220 = vmatprep.subr.mxu0 %v49_v12 }
  0x4a   :  { %221 = vmatpush3.xpose.msra.mxu0 %v49_v12 }
  0x4b   :  { %222 = vmatprep.subr.mxu0 %v48_v13 }
  0x4e   :  { %223 = vmatpush3.xpose.msra.mxu0 %v48_v13 }
  0x4f   :  { %224 = vmatprep.subr.mxu0 %v47_v14 }
  0x52   :  { %225 = vmatpush3.xpose.msra.mxu0 %v47_v14 }
  0x53   :  { %226 = vmatprep.subr.mxu0 %v46_v15 }
  0x56   :  { %227 = vmatpush3.xpose.msra.mxu0 %v46_v15 }
  0x57   :  { %228 = vmatprep.subr.mxu0 %v45_v16 }
  0x5a   :  { %229 = vmatpush3.xpose.msra.mxu0 %v45_v16 }
  0x5d   :  { %231 = vmatmul.mubr.f32.vlgmr.msra.gmra.mxu0 %v44_v17 }
 0x11d   :  { %v232_v19 = vpop.f32.mrf.mxu0 }
 0x11e   :  { %v148_v20 = vadd.f32 %v232_v19, %v179_v18 }
 0x11f   :  { %v127_v21 = vpop.f32.mrf.mxu0 }
 0x120   :  { %150 = vst [vmem:[#allocation7 + $0x8] sm:$0xff] %v148_v20  ;;  %v147_v22 = vadd.f32 %v179_v18, %v127_v21 }
 0x122   :  { %149 = vst [vmem:[#allocation7] sm:$0xff] %v147_v22 }
 0x123   :  { %289 = shalt.err (!%p286_p0)
}
 0x124   :  { %172 = dma.vmem_to_hbm [thread:$0]  %s167_s25, 256, %s353_s3, [#allocation4], %s305_s15, %s305_s15, %s306_s16  }
 0x125   :  { %302 = dma.done.wait [#allocation4], 256  }
 0x126   :  { %303 = vsyncadd [#allocation4], 4294967040 }
 0x127   :  { %176 = vsyncpa [#allocation3], 1 }
 0x128   :  { %177 = vsyncpa [#allocation6], 1 }
 0x129   :  { %178 = vsyncpa [#allocation4], 1 }

</bundles_post_ra>
